<compile_context>
chip_gen: v5e
topology: v5e:2x2
jax: 0.10.0
libtpu: 0.0.40
codegen_flags: <defaults>
</compile_context>

<pallas_src>
import functools

import jax
import jax.numpy as jnp
from jax import lax
from jax.experimental import pallas as pl
from jax.experimental.pallas import tpu as pltpu


def _actor_critic_kernel(x_ref, w_ref, b_ref, out_ref, *, num_actions):
    # bf16 x / bf16 fused weights, f32 accumulation on the MXU, f32 bias add.
    fused = jnp.dot(x_ref[...], w_ref[...],
                    preferred_element_type=jnp.float32) + b_ref[...]   # (TB, 128) f32

    # (1, 128) policy-lane mask row (broadcast against the tile; avoids a full
    # (TB, 128) iota temporary).
    col = lax.broadcasted_iota(jnp.int32, (1, fused.shape[-1]), 1)
    is_policy = col < num_actions

    # Masked softmax over the policy lanes only (padded lanes -> -inf -> 0 prob),
    # all 128 lanes wide, f32 throughout.
    logits = jnp.where(is_policy, fused, -jnp.inf)
    m = jnp.max(logits, axis=-1, keepdims=True)
    e = jnp.exp(logits - m)
    denom = jnp.sum(e, axis=-1, keepdims=True)
    probs = e / denom          # exact normalization (HBM-bound; approx buys nothing)

    # Lane-dense output slab: [softmax(policy) | value | zero padding].
    out_ref[...] = jnp.where(is_policy, probs, fused)


def _round_up(v, m):
    return ((v + m - 1) // m) * m


def actor_critic_forward(x, wv, bv, wp, bp, *, block_b=2048):
    B, K = x.shape
    A = wp.shape[1]
    N = 128  # lane-dense fused width
    assert K == 256, "ActorCritic has fixed in_features=256"
    assert A + 1 <= N, "fused lane-dense slab assumes num_actions + 1 <= 128"

    # Fuse + pad weights/biases into lane-dense slabs (plain JAX, done once).
    # Weights go to bf16 for the MXU; the bias row stays f32 (added post-matmul).
    w_pad = jnp.zeros((K, N), jnp.float32)
    w_pad = w_pad.at[:, :A].set(wp.astype(jnp.float32))
    w_pad = w_pad.at[:, A:A + 1].set(wv.astype(jnp.float32))
    w_pad = w_pad.astype(jnp.bfloat16)
    b_pad = jnp.zeros((1, N), jnp.float32)
    b_pad = b_pad.at[:, :A].set(bp.reshape(1, A).astype(jnp.float32))
    b_pad = b_pad.at[:, A:A + 1].set(bv.reshape(1, 1).astype(jnp.float32))

    x_bf16 = x.astype(jnp.bfloat16)

    # Batch tiling: biggest tile that fits scoped VMEM, but never bigger than the
    # (8-aligned) batch, and split small batches into ~2 blocks so both v7x
    # TensorCores get work on the "parallel" axis.
    tb = min(block_b, _round_up(B, 8))
    if B <= block_b and B > 16:
        tb = _round_up(pl.cdiv(B, 2), 16)   # ~2 blocks, 16-row aligned for bf16
    grid = (pl.cdiv(B, tb),)                # ragged last block handled by Pallas

    kernel = functools.partial(_actor_critic_kernel, num_actions=A)

    slab = pl.pallas_call(
        kernel,
        out_shape=jax.ShapeDtypeStruct((B, N), jnp.float32),
        grid=grid,
        in_specs=[
            pl.BlockSpec((tb, K), lambda i: (i, 0)),   # x: tiled over batch (bf16)
            # TODO(synk): pipeline_mode=pl.Buffered(1) on the two constant blocks
            # would reclaim ~64 KiB of redundant double-buffer VMEM.
            pl.BlockSpec((K, N), lambda i: (0, 0)),    # fused weights: replicated
            pl.BlockSpec((1, N), lambda i: (0, 0)),    # fused bias row: replicated
        ],
        out_specs=pl.BlockSpec((tb, N), lambda i: (i, 0)),
        compiler_params=pltpu.CompilerParams(
            dimension_semantics=("parallel",)),        # shard batch blocks across TCs
    )(x_bf16, w_pad, b_pad)

    policy = slab[:B, :A]
    value = slab[:B, A:A + 1]
    return policy, value


def init_params(key, num_actions, in_features=256):
    # Deterministic synthetic init (mimics nn.Linear uniform(-1/sqrt(in), 1/sqrt(in))).
    k1, k2, k3, k4 = jax.random.split(key, 4)
    bound = 1.0 / jnp.sqrt(jnp.float32(in_features))
    wv = jax.random.uniform(k1, (in_features, 1), jnp.float32, -bound, bound)
    bv = jax.random.uniform(k2, (1, 1), jnp.float32, -bound, bound)
    wp = jax.random.uniform(k3, (in_features, num_actions), jnp.float32, -bound, bound)
    bp = jax.random.uniform(k4, (1, num_actions), jnp.float32, -bound, bound)
    return wv, bv, wp, bp


if __name__ == "__main__":
    key = jax.random.PRNGKey(0)
    kx, kp = jax.random.split(key)

    B = 8               # batch
    NUM_ACTIONS = 4     # num_actions
    IN_FEATURES = 256   # fixed by the module

    x = jax.random.normal(kx, (B, IN_FEATURES), jnp.float32)
    wv, bv, wp, bp = init_params(kp, NUM_ACTIONS, IN_FEATURES)

    policy, value = actor_critic_forward(x, wv, bv, wp, bp)
    jax.block_until_ready((policy, value))

    # Correctness check against plain-JAX f32 reference (kernel matmul runs in
    # bf16 with f32 accumulation -> tolerances loosened accordingly).
    value_ref = x @ wv + bv
    policy_ref = jax.nn.softmax(x @ wp + bp, axis=-1)
    assert policy.shape == (B, NUM_ACTIONS) and value.shape == (B, 1)
    assert jnp.allclose(value, value_ref, atol=2e-2)
    assert jnp.allclose(policy, policy_ref, atol=2e-2)
    assert jnp.allclose(jnp.sum(policy, axis=-1), 1.0, atol=1e-3)

    print("KERNEL_OK")
</pallas_src>

<mosaic_0001>
module attributes {stable_mosaic.version = 11 : i64} {
  func.func @_actor_critic_kernel(%arg0: i32, %arg1: memref<8x256xbf16, #tpu.memory_space<vmem>>, %arg2: memref<256x128xbf16, #tpu.memory_space<vmem>>, %arg3: memref<1x128xf32, #tpu.memory_space<vmem>>, %arg4: memref<8x128xf32, #tpu.memory_space<vmem>>) attributes {dimension_semantics = [#tpu.dimension_semantics<parallel>], iteration_bounds = array<i64: 1>, scalar_prefetch = 0 : i64, scratch_operands = 0 : i64, tpu.core_type = #tpu.core_type<tc>, window_params = [{transform_indices = @transform_0, window_bounds = array<i64: 8, 256>}, {pipeline_mode = #tpu.pipeline_mode<synchronous>, transform_indices = @transform_1, window_bounds = array<i64: 256, 128>}, {pipeline_mode = #tpu.pipeline_mode<synchronous>, transform_indices = @transform_2, window_bounds = array<i64: 1, 128>}, {transform_indices = @transform_3, window_bounds = array<i64: 8, 128>}]} {
    %c0 = arith.constant 0 : index
    %c0_0 = arith.constant 0 : index
    %0 = vector.load %arg1[%c0, %c0_0] : memref<8x256xbf16, #tpu.memory_space<vmem>>, vector<8x256xbf16>
    %c0_1 = arith.constant 0 : index
    %c0_2 = arith.constant 0 : index
    %1 = vector.load %arg2[%c0_1, %c0_2] : memref<256x128xbf16, #tpu.memory_space<vmem>>, vector<256x128xbf16>
    %cst = arith.constant dense<0.000000e+00> : vector<8x128xf32>
    %2 = tpu.matmul %0, %1, %cst {dimension_numbers = #tpu.dot_dimension_numbers<[1], [0], [0], [1], [0, 0, 1, 1], [], []>} : vector<8x256xbf16>, vector<256x128xbf16>, vector<8x128xf32> -> vector<8x128xf32>
    %c0_3 = arith.constant 0 : index
    %c0_4 = arith.constant 0 : index
    %3 = vector.load %arg3[%c0_3, %c0_4] : memref<1x128xf32, #tpu.memory_space<vmem>>, vector<1x128xf32>
    %4 = vector.broadcast %3 : vector<1x128xf32> to vector<8x128xf32>
    %5 = arith.addf %2, %4 : vector<8x128xf32>
    %6 = tpu.iota {dimensions = array<i32: 1>} : vector<1x128xi32>
    %c4_i32 = arith.constant 4 : i32
    %7 = vector.broadcast %c4_i32 : i32 to vector<1x128xi32>
    %8 = arith.cmpi slt, %6, %7 : vector<1x128xi32>
    %cst_5 = arith.constant 0xFF800000 : f32
    %9 = vector.shape_cast %8 : vector<1x128xi1> to vector<1x128xi1>
    %10 = vector.broadcast %9 : vector<1x128xi1> to vector<8x128xi1>
    %11 = vector.broadcast %cst_5 : f32 to vector<8x128xf32>
    %12 = arith.select %10, %5, %11 : vector<8x128xi1>, vector<8x128xf32>
    %cst_6 = arith.constant dense<0xFF800000> : vector<8xf32>
    %13 = vector.multi_reduction <maximumf>, %12, %cst_6 [1] : vector<8x128xf32> to vector<8xf32>
    %14 = vector.shape_cast %13 : vector<8xf32> to vector<8x1xf32>
    %15 = vector.broadcast %14 : vector<8x1xf32> to vector<8x128xf32>
    %16 = arith.subf %12, %15 : vector<8x128xf32>
    %17 = math.exp %16 : vector<8x128xf32>
    %cst_7 = arith.constant dense<0.000000e+00> : vector<8xf32>
    %18 = vector.multi_reduction <add>, %17, %cst_7 [1] : vector<8x128xf32> to vector<8xf32>
    %19 = vector.shape_cast %18 : vector<8xf32> to vector<8x1xf32>
    %20 = vector.broadcast %19 : vector<8x1xf32> to vector<8x128xf32>
    %21 = arith.divf %17, %20 : vector<8x128xf32>
    %22 = vector.shape_cast %8 : vector<1x128xi1> to vector<1x128xi1>
    %23 = vector.broadcast %22 : vector<1x128xi1> to vector<8x128xi1>
    %24 = arith.select %23, %21, %5 : vector<8x128xi1>, vector<8x128xf32>
    %c0_8 = arith.constant 0 : index
    %c0_9 = arith.constant 0 : index
    %25 = vector.load %arg4[%c0_8, %c0_9] : memref<8x128xf32, #tpu.memory_space<vmem>>, vector<8x128xf32>
    tpu.vector_store %arg4[%c0_8, %c0_9], %24 {strides = array<i32>} : memref<8x128xf32, #tpu.memory_space<vmem>>, vector<8x128xf32>,
    return
  }
  func.func @transform_0(%arg0: i32) -> (i32, i32) {
    %c0_i32 = arith.constant 0 : i32
    %c0_i32_0 = arith.constant 0 : i32
    return %arg0, %c0_i32 : i32, i32
  }
  func.func @transform_1(%arg0: i32) -> (i32, i32) {
    %c0_i32 = arith.constant 0 : i32
    %c0_i32_0 = arith.constant 0 : i32
    %c0_i32_1 = arith.constant 0 : i32
    return %c0_i32, %c0_i32_0 : i32, i32
  }
  func.func @transform_2(%arg0: i32) -> (i32, i32) {
    %c0_i32 = arith.constant 0 : i32
    %c0_i32_0 = arith.constant 0 : i32
    %c0_i32_1 = arith.constant 0 : i32
    return %c0_i32, %c0_i32_0 : i32, i32
  }
  func.func @transform_3(%arg0: i32) -> (i32, i32) {
    %c0_i32 = arith.constant 0 : i32
    %c0_i32_0 = arith.constant 0 : i32
    return %arg0, %c0_i32 : i32, i32
  }
}

</mosaic_0001>

<bundles_post_ra>
// kernel: tpu_custom_call.1
= control target key start
LH: loop header
LB: loop body
LE: loop exit
PB: predicated region body
PF: predicated region fallthrough
CT: control target
= control target key end

     0   :  { %8 = vsyncpa [#allocation3], 0  ;;  %s466_s0 = inlined_call_operand.hbm [shape: bf16[8,256], index: 0, kind: input, shape index: {}]   ;;  %s467_s1 = inlined_call_operand.hbm [shape: bf16[256,128], index: 1, kind: input, shape index: {}]   ;;  %s468_s2 = inlined_call_operand.vmem [shape: f32[1,128], index: 2, kind: input, shape index: {}]   ;;  %s469_s3 = inlined_call_operand.hbm [shape: f32[8,128], index: 3, kind: output, shape index: {}]  }
   0x1   :  { %9 = vsyncpa [#allocation6], 0 }
   0x2   :  { %10 = vsyncpa [#allocation4], 0  ;;  %s16_s14 = sshll.u32 %s466_s0, 4  ;;  %s427_s15 = smov [#allocation2]   ;;  %s17_s14 = int_to_ptr.hbm [resolvable:$true] %s16_s14 }
   0x3   :  { %s18_s16 = sshll.u32 %s427_s15, 4  ;;  %s26_s19 = sshll.u32 %s467_s1, 4  ;;  %s19_s16 = int_to_ptr.vmem [resolvable:$true] %s18_s16  ;;  %s27_s19 = int_to_ptr.hbm [resolvable:$true] %s26_s19 }
   0x4   :  { %21 = dma.hbm_to_vmem [thread:$0]  %s17_s14, 128, %s19_s16, [#allocation3]  }
   0x5   :  { %s428_s20 = smov [#allocation5]   ;;  %s429_s22 = smov 64  }
   0x6   :  { %s28_s21 = sshll.u32 %s428_s20, 4  ;;  %s430_s23 = smov 4   ;;  %s29_s21 = int_to_ptr.vmem [resolvable:$true] %s28_s21 }
   0x7   :  { %34 = dma.hbm_to_vmem [thread:$0]  %s27_s19, 2048, %s29_s21, [#allocation6], %s429_s22, %s429_s22, %s430_s23  }
   0x8   :  { %421 = dma.done.wait [#allocation3], 128  }
   0x9   :  { %422 = vsyncadd [#allocation3], 4294967168 }
   0xa   :  { %423 = dma.done.wait [#allocation6], 2048  }
   0xb   :  { %424 = vsyncadd [#allocation6], 4294965248  ;;  %v330_v0 = vld [vmem:[#allocation5 + $0x38] sm:$0xff]  ;;  %v329_v2 = vld [vmem:[#allocation5 + $0x30] sm:$0xff]  ;;  %v211_v21 = vlaneseq  ;;  %s248_s27 = sshll.u32 %s469_s3, 4  ;;  %s249_s27 = int_to_ptr.hbm [resolvable:$true] %s248_s27 }
   0xc   :  { %v338_v1 = vld [vmem:[#allocation5 + $0x78] sm:$0xff]  ;;  %185 = vmatpush.bf16.msra.mxu0 %v330_v0  ;;  %v337_v3 = vld [vmem:[#allocation5 + $0x70] sm:$0xff]  ;;  %v328_v4 = vld [vmem:[#allocation5 + $0x28] sm:$0xff] }
   0xd   :  { %198 = vmatpush.bf16.msra.mxu1 %v338_v1  ;;  %v336_v5 = vld [vmem:[#allocation5 + $0x68] sm:$0xff]  ;;  %v327_v6 = vld [vmem:[#allocation5 + $0x20] sm:$0xff]  ;;  %v326_v8 = vld [vmem:[#allocation5 + $0x18] sm:$0xff]  ;;  %v212_v23 = vand.u32 127, %v211_v21 }
   0xe   :  { %v335_v7 = vld [vmem:[#allocation5 + $0x60] sm:$0xff]  ;;  %v334_v9 = vld [vmem:[#allocation5 + $0x58] sm:$0xff]  ;;  %v325_v10 = vld [vmem:[#allocation5 + $0x10] sm:$0xff] }
   0xf   :  { %v333_v11 = vld [vmem:[#allocation5 + $0x50] sm:$0xff]  ;;  %v324_v12 = vld [vmem:[#allocation5 + $0x8] sm:$0xff]  ;;  %v45_v14 = vld [vmem:[#allocation2] sm:$0xff]  ;;  %vm213_vm0 = vcmp.lt.s32.totalorder %v212_v23, 4 }
  0x10   :  { %186 = vmatpush.bf16.msra.mxu0 %v329_v2  ;;  %v332_v13 = vld [vmem:[#allocation5 + $0x48] sm:$0xff]  ;;  %v83_v15 = vunpack.c.l.b16 %v45_v14  ;;  %v84_v16 = vunpack.c.h.b16 %v45_v14  ;;  %v323_v17 = vld [vmem:[#allocation5] sm:$0xff]  ;;  %v344_v22 = vld [vmem:[%s468_s2] ss:$0 sm:$0xff]  ;;  %s431_s2 = smov [#allocation7]  }
  0x11   :  { %199 = vmatpush.bf16.msra.mxu1 %v337_v3  ;;  %v331_v18 = vld [vmem:[#allocation5 + $0x40] sm:$0xff]  ;;  %s246_s24 = sshll.u32 %s431_s2, 4  ;;  %s247_s24 = int_to_ptr.vmem [resolvable:$true] %s246_s24 }
  0x12   :  { %v85_v19 = vpack.c.b16 %v83_v15, %v83_v15  ;;  %v86_v20 = vpack.c.b16 %v84_v16, %v84_v16 }
  0x14   :  { %187 = vmatpush.bf16.msra.mxu0 %v328_v4 }
  0x15   :  { %200 = vmatpush.bf16.msra.mxu1 %v336_v5 }
  0x18   :  { %188 = vmatpush.bf16.msra.mxu0 %v327_v6 }
  0x19   :  { %201 = vmatpush.bf16.msra.mxu1 %v335_v7 }
  0x1c   :  { %189 = vmatpush.bf16.msra.mxu0 %v326_v8 }
  0x1d   :  { %202 = vmatpush.bf16.msra.mxu1 %v334_v9 }
  0x20   :  { %190 = vmatpush.bf16.msra.mxu0 %v325_v10 }
  0x21   :  { %203 = vmatpush.bf16.msra.mxu1 %v333_v11 }
  0x24   :  { %191 = vmatpush.bf16.msra.mxu0 %v324_v12 }
  0x25   :  { %204 = vmatpush.bf16.msra.mxu1 %v332_v13 }
  0x28   :  { %192 = vmatpush.bf16.msra.mxu0 %v323_v17 }
  0x29   :  { %205 = vmatpush.bf16.msra.mxu1 %v331_v18 }
  0x2b   :  { %193 = vmatmul.bf16.vlgmr.msra.gmra.mxu0 %v85_v19 }
  0x2c   :  { %206 = vmatmul.bf16.vlgmr.msra.gmra.mxu1 %v86_v20 }
  0xa8   :  { %v194_v24 = vpop.f32.mrf.mxu0 }
  0xa9   :  { %v207_v25 = vpop.f32.mrf.mxu1  ;;  %v195_v26 = vadd.f32 %v344_v22, %v194_v24 }
  0xab   :  { %v208_v27 = vadd.f32 %v207_v25, %v195_v26 }
  0xad   :  { %v216_v28 = vsel %vm213_vm0, %v208_v27, -inf }
  0xae   :  { %217 = vmax.xlane.f32.xlu0 %v216_v28 }
  0xb0   :  { %v196_v29 = vpop.f32.mrf.mxu0 }
  0xb1   :  { %v209_v30 = vpop.f32.mrf.mxu1 }
 0x121   :  { %v218_v31 = vpop.xlane.xlu0 %217 }
 0x122   :  { %v219_v32 = vsub.f32 %v216_v28, %v218_v31 }
 0x124   :  { %v220_v33 = vmul.f32 1.442695, %v219_v32 }
 0x126   :  { %345 = vpow2.f32 %v220_v33 }
 0x12c   :  { %v346_v34 = vpop.eup %345 }
 0x12d   :  { %222 = vadd.xlane.f32.xlu0 %v346_v34 }
 0x1a0   :  { %v223_v35 = vpop.xlane.xlu0 %222 }
 0x1a1   :  { %347 = vrcp.f32 %v223_v35  ;;  %v235_v39 = vand.u32 2147483648, %v223_v35  ;;  %v233_v41 = vand.u32 2147483647, %v223_v35  ;;  %vm229_vm2 = vweird.f32 %v223_v35 }
 0x1a3   :  { %v236_v43 = vor.u32 1.1754944e-38, %v235_v39  ;;  %vm234_vm4 = vcmp.eq.f32.partialorder %v233_v41, 8.507059e+37 }
 0x1a7   :  { %v348_v36 = vpop.eup %347 }
 0x1a8   :  { %v225_v37 = vmul.f32 %v348_v36, %v223_v35  ;;  %vm230_vm1 = vweird.f32 %v348_v36 }
 0x1a9   :  { %vm231_vm3 = vmor %vm229_vm2, %vm230_vm1 }
 0x1aa   :  { %v226_v38 = vsub.f32 1.0, %v225_v37 }
 0x1ac   :  { %v227_v40 = vmul.f32 %v348_v36, %v226_v38 }
 0x1ae   :  { %v228_v42 = vadd.f32 %v348_v36, %v227_v40 }
 0x1b0   :  { %v232_v44 = vsel %vm231_vm3, %v348_v36, %v228_v42 }
 0x1b1   :  { %v237_v45 = vsel %vm234_vm4, %v236_v43, %v232_v44 }
 0x1b2   :  { %v238_v46 = vmul.f32 %v346_v34, %v237_v45 }
 0x1b4   :  { %v239_v47 = vsel %vm213_vm0, %v238_v46, %v208_v27 }
 0x1b5   :  { %240 = vst [vmem:[#allocation7] sm:$0xff] %v239_v47 }
 0x1b6   :  { %251 = dma.vmem_to_hbm [thread:$0]  %s247_s24, 128, %s249_s27, [#allocation4]  }
 0x1b7   :  { %425 = dma.done.wait [#allocation4], 128  }
 0x1b8   :  { %426 = vsyncadd [#allocation4], 4294967168 }
 0x1b9   :  { %256 = vsyncpa [#allocation3], 1 }
 0x1ba   :  { %257 = vsyncpa [#allocation6], 1 }
 0x1bb   :  { %258 = vsyncpa [#allocation4], 1 }

</bundles_post_ra>
